<compile_context>
chip_gen: v7x
topology: tpu7x:2x2x1
jax: 0.10.0
libtpu: 0.0.40
codegen_flags: <defaults>
</compile_context>

<pallas_src>
import math

import jax
import jax.numpy as jnp
from jax import lax
from jax.experimental import pallas as pl
from jax.experimental.pallas import tpu as pltpu

B, H, X, Y = 8, 32, 16, 16          # batch, hidden dim, state dim, obs dim
_LANES = 128                        # lane-dense tile width
_XL = H + Y                         # 48: first lane of x / loc / vec
_CL = _XL + X                       # 64: lane of the isotropic scale coeff c
_R_ONE = _LANES - 1                 # 127: constant-1 lane (bias row of W1/W2)
_LOG2PI = math.log(2.0 * math.pi)
_LOG_MAXEXP = math.log(8.0)         # clamp(exp(c), -8, 8) == exp(min(c, log 8))

# Output contract (per grid step): lanes [0, H) carry ha_new, every lane >= H
# carries the broadcast scalar loss of that step.
assert H < _LANES and _CL + 1 <= _R_ONE


def dan_kernel(ha0_ref, xy_ref, slab_ref, out_ref, ha_scr):
    step = pl.program_id(0)

    @pl.when(step == 0)
    def _():
        ha_scr[...] = ha0_ref[...]          # ha in lanes [0,H), zero elsewhere

    # Per-step input: y @ [H,_XL), x @ [_XL,_CL), 1.0 @ lane 127, zero elsewhere.
    xin = xy_ref[...]                       # (B, 128) f32
    zin = ha_scr[...] + xin                 # ha | y | x | 0... | 1

    w1 = slab_ref[0:_LANES, :]              # (128, 128) bf16
    w2 = slab_ref[_LANES:2 * _LANES, :]     # (128, 128) bf16

    # Matmul #1: lanes [0,H) -> ha_new = a(cat([b(ha), y]));
    #            lanes [_XL,_CL] -> vec_b = c(b(ha));  lane 127 -> 1.0.
    # (W1 rows [_XL,_CL) are zero, so the x lanes of zin do not contribute.)
    t1 = jnp.dot(zin.astype(jnp.bfloat16), w1, preferred_element_type=jnp.float32)
    # Matmul #2: lanes [_XL,_CL] -> vec_a = c(ha_new)  (W2 rows >= H are zero,
    # so the vec_b / constant lanes of t1 do not contribute).
    t2 = jnp.dot(t1.astype(jnp.bfloat16), w2, preferred_element_type=jnp.float32)

    lane = lax.broadcasted_iota(jnp.int32, (B, _LANES), 1)
    xmask = (lane >= _XL) & (lane < _CL)

    # Gaussian(X, vec): loc = vec[:, :X]; isotropic scale_tril =
    # clamp(exp(c), -8, 8) * I == exp(min(c, log 8)) * I since exp(c) > 0.
    # x and both locs live on the same lanes -> plain masked full-width diffs.
    diff_b = jnp.where(xmask, xin - t1, 0.0)
    diff_a = jnp.where(xmask, xin - t2, 0.0)
    ss_b = jnp.sum(diff_b * diff_b, axis=1, keepdims=True)      # (B, 1)
    ss_a = jnp.sum(diff_a * diff_a, axis=1, keepdims=True)      # (B, 1)
    c_b = jnp.minimum(t1[:, _CL:_CL + 1], _LOG_MAXEXP)          # (B, 1)
    c_a = jnp.minimum(t2[:, _CL:_CL + 1], _LOG_MAXEXP)          # (B, 1)

    lp = (-0.5) * (ss_a * jnp.exp(-2.0 * c_a) + ss_b * jnp.exp(-2.0 * c_b)) \
         - X * (c_a + c_b) - X * _LOG2PI                         # lp_a + lp_b
    loss = -jnp.mean(lp)                                         # Lt_qta + Lt_qtb

    out_ref[...] = jnp.where(lane < H, t1, loss)
    ha_scr[...] = jnp.where(lane < H, t1, 0.0)                   # carry ha to next step


def pack_params(params):
    """Fold the Linear compositions (hb is internal) and pack everything into
    one (256, 128) bf16 slab.  Call ONCE (params are static across steps) and
    pass the result to dan_forward / dan_rollout.

    Slab layout (zero elsewhere):
      rows   0:128  W1:  rows [0,H)    cols [0,H)      = Wb @ Wah
                         rows [0,H)    cols [_XL,_CL]  = Wb @ Wc
                         rows [H,H+Y)  cols [0,H)      = Way
                         row  127      cols [0,H)      = bb @ Wah + ba
                         row  127      cols [_XL,_CL]  = bb @ Wc + bc
                         row  127      col  127        = 1   (keeps the constant
                                                              lane alive in t1)
      rows 128:256  W2:  rows [0,H)    cols [_XL,_CL]  = Wc
                         row  127      cols [_XL,_CL]  = bc
    The constant-1 input lane (127) turns both biases into matmul rows.
    """
    Wb, bb, Wah, Way, ba, Wc, bc = params
    w1 = jnp.zeros((_LANES, _LANES), jnp.float32)
    w1 = w1.at[0:H, 0:H].set(Wb @ Wah)
    w1 = w1.at[0:H, _XL:_CL + 1].set(Wb @ Wc)
    w1 = w1.at[H:H + Y, 0:H].set(Way)
    w1 = w1.at[_R_ONE, 0:H].set((bb @ Wah + ba)[0])
    w1 = w1.at[_R_ONE, _XL:_CL + 1].set((bb @ Wc + bc)[0])
    w1 = w1.at[_R_ONE, _R_ONE].set(1.0)

    w2 = jnp.zeros((_LANES, _LANES), jnp.float32)
    w2 = w2.at[0:H, _XL:_CL + 1].set(Wc)
    w2 = w2.at[_R_ONE, _XL:_CL + 1].set(bc[0])

    return jnp.concatenate([w1, w2], axis=0).astype(jnp.bfloat16)


@jax.jit
def dan_rollout(ha0, xs, ys, slab):
    """Run T fused assimilation cycles: (loss_t, ha_{t+1}) = DAN(ha_t, x_t, y_t).

    ha0: (B, H); xs: (T, B, X); ys: (T, B, Y); slab: pack_params(params).
    Returns (losses (T,), has (T, B, H)); has[t] is ha after step t.
    """
    T = xs.shape[0]

    # Lane-dense packing, one concat per array (no scatter of tiny DUS ops).
    ha0p = jnp.concatenate(
        [ha0, jnp.zeros((B, _LANES - H), jnp.float32)], axis=1)
    xy = jnp.concatenate(
        [jnp.zeros((T, B, H), jnp.float32), ys, xs,
         jnp.zeros((T, B, _R_ONE - _CL), jnp.float32),
         jnp.ones((T, B, 1), jnp.float32)], axis=2)

    flops = T * (2 * 2 * B * _LANES * _LANES + 16 * B * _LANES)
    bytes_accessed = (2 * _LANES * _LANES * 2 + B * _LANES * 4
                      + T * 2 * B * _LANES * 4)

    out = pl.pallas_call(
        dan_kernel,
        out_shape=jax.ShapeDtypeStruct((T, B, _LANES), jnp.float32),
        grid_spec=pltpu.PrefetchScalarGridSpec(
            num_scalar_prefetch=0,
            grid=(T,),
            in_specs=[
                pl.BlockSpec((B, _LANES), lambda t: (0, 0)),           # ha0 (resident)
                pl.BlockSpec((None, B, _LANES), lambda t: (t, 0, 0)),  # per-step (y, x, 1)
                pl.BlockSpec((2 * _LANES, _LANES), lambda t: (0, 0)),  # weight slab (resident)
            ],
            out_specs=pl.BlockSpec((None, B, _LANES), lambda t: (t, 0, 0)),
            scratch_shapes=[pltpu.VMEM((B, _LANES), jnp.float32)],     # ha carry
        ),
        compiler_params=pltpu.CompilerParams(
            dimension_semantics=("arbitrary",)),                       # sequential recurrence
        cost_estimate=pl.CostEstimate(flops=flops, transcendentals=2 * B * T,
                                      bytes_accessed=bytes_accessed),
    )(ha0p, xy, slab)

    losses = out[:, 0, H]          # broadcast scalar lives in every lane >= H
    has = out[:, :, :H]
    return losses, has


def dan_forward(ha, x, y, slab):
    """Single DAN step (== the PyTorch module's forward): returns (loss, ha_new)."""
    losses, has = dan_rollout(ha, x[None], y[None], slab)
    return losses[0], has[0]


def _linear_params(key, fan_in, fan_out):
    """Deterministic torch.nn.Linear-style init: U(-1/sqrt(fan_in), 1/sqrt(fan_in))."""
    kw, kb = jax.random.split(key)
    bound = 1.0 / math.sqrt(fan_in)
    w = jax.random.uniform(kw, (fan_in, fan_out), jnp.float32, -bound, bound)
    b = jax.random.uniform(kb, (1, fan_out), jnp.float32, -bound, bound)
    return w, b


def _dan_ref(ha, x, y, params):
    """Plain-JAX f32 reference: literal (unfolded) translation of the PyTorch module."""
    Wb, bb, Wah, Way, ba, Wc, bc = params
    hb = ha @ Wb + bb
    vec_b = hb @ Wc + bc
    ha_new = hb @ Wah + y @ Way + ba
    vec_a = ha_new @ Wc + bc

    def nml(vec):
        loc = vec[:, :X]
        sigma = jnp.clip(jnp.exp(vec[:, X:X + 1]), -8.0, 8.0)  # clamp on exp, as in torch code
        diff = x - loc
        maha = jnp.sum(diff * diff, axis=1, keepdims=True) / (sigma * sigma)
        lp = -0.5 * maha - X * jnp.log(sigma) - 0.5 * X * _LOG2PI
        return -jnp.mean(lp)

    return nml(vec_a) + nml(vec_b), ha_new


if __name__ == "__main__":
    key = jax.random.PRNGKey(0)
    ks = jax.random.split(key, 8)

    ha = jax.random.normal(ks[0], (B, H), jnp.float32)
    x = jax.random.normal(ks[1], (B, X), jnp.float32)
    y = jax.random.normal(ks[2], (B, Y), jnp.float32)

    Wb, bb = _linear_params(ks[3], H, H)
    Wa, ba = _linear_params(ks[4], H + Y, H)
    Wah, Way = Wa[:H], Wa[H:]
    Wc, bc = _linear_params(ks[5], H, X + 1)
    params = (Wb, bb, Wah, Way, ba, Wc, bc)

    slab = jax.block_until_ready(pack_params(params))    # packed ONCE, reused below

    # --- single step (the module's forward) ---
    loss, ha_new = dan_forward(ha, x, y, slab)
    jax.block_until_ready((loss, ha_new))
    loss_ref, ha_ref = _dan_ref(ha, x, y, params)
    # bf16 MXU operands + folded weights vs. the literal f32 reference -> 2e-2 tol.
    assert jnp.allclose(loss, loss_ref, rtol=2e-2, atol=2e-2), (loss, loss_ref)
    assert jnp.allclose(ha_new, ha_ref, rtol=2e-2, atol=2e-2)

    # --- fused T-step rollout (weights resident in VMEM, ha carried in scratch) ---
    T = 4
    xs = jax.random.normal(ks[6], (T, B, X), jnp.float32)
    ys = jax.random.normal(ks[7], (T, B, Y), jnp.float32)
    losses, has = dan_rollout(ha, xs, ys, slab)
    jax.block_until_ready((losses, has))

    ha_r = ha
    for t in range(T):
        loss_r, ha_r = _dan_ref(ha_r, xs[t], ys[t], params)
        assert jnp.allclose(losses[t], loss_r, rtol=2e-2, atol=2e-2), (t, losses[t], loss_r)
        assert jnp.allclose(has[t], ha_r, rtol=2e-2, atol=2e-2), t

    print("KERNEL_OK")
</pallas_src>

<mosaic_0001>
module attributes {stable_mosaic.version = 11 : i64} {
  func.func @dan_kernel(%arg0: i32, %arg1: memref<8x128xf32, #tpu.memory_space<vmem>>, %arg2: memref<1x8x128xf32, #tpu.memory_space<vmem>>, %arg3: memref<256x128xbf16, #tpu.memory_space<vmem>>, %arg4: memref<1x8x128xf32, #tpu.memory_space<vmem>>, %arg5: memref<8x128xf32, #tpu.memory_space<vmem>>) attributes {dimension_semantics = [#tpu.dimension_semantics<arbitrary>], iteration_bounds = array<i64: 1>, scalar_prefetch = 0 : i64, scratch_operands = 1 : i64, tpu.core_type = #tpu.core_type<tc>, window_params = [{pipeline_mode = #tpu.pipeline_mode<synchronous>, transform_indices = @transform_0, window_bounds = array<i64: 8, 128>}, {transform_indices = @transform_1, window_bounds = array<i64: 1, 8, 128>}, {pipeline_mode = #tpu.pipeline_mode<synchronous>, transform_indices = @transform_2, window_bounds = array<i64: 256, 128>}, {transform_indices = @transform_3, window_bounds = array<i64: 1, 8, 128>}]} {
    %c0_i32 = arith.constant 0 : i32
    %0 = arith.cmpi eq, %arg0, %c0_i32 : i32
    %1 = arith.extui %0 : i1 to i32
    %c0_i32_0 = arith.constant 0 : i32
    %2 = arith.cmpi ne, %1, %c0_i32_0 : i32
    scf.if %2 {
      %c0_30 = arith.constant 0 : index
      %c0_31 = arith.constant 0 : index
      %72 = vector.load %arg1[%c0_30, %c0_31] : memref<8x128xf32, #tpu.memory_space<vmem>>, vector<8x128xf32>
      %c0_32 = arith.constant 0 : index
      %c0_33 = arith.constant 0 : index
      %73 = vector.load %arg5[%c0_32, %c0_33] : memref<8x128xf32, #tpu.memory_space<vmem>>, vector<8x128xf32>
      tpu.vector_store %arg5[%c0_32, %c0_33], %72 {strides = array<i32>} : memref<8x128xf32, #tpu.memory_space<vmem>>, vector<8x128xf32>,
    } else {
    }
    %c0 = arith.constant 0 : index
    %c0_1 = arith.constant 0 : index
    %c0_2 = arith.constant 0 : index
    %3 = vector.load %arg2[%c0, %c0_1, %c0_2] : memref<1x8x128xf32, #tpu.memory_space<vmem>>, vector<1x8x128xf32>
    %4 = vector.shape_cast %3 : vector<1x8x128xf32> to vector<8x128xf32>
    %c0_3 = arith.constant 0 : index
    %c0_4 = arith.constant 0 : index
    %5 = vector.load %arg5[%c0_3, %c0_4] : memref<8x128xf32, #tpu.memory_space<vmem>>, vector<8x128xf32>
    %6 = arith.addf %5, %4 : vector<8x128xf32>
    %c0_5 = arith.constant 0 : index
    %c0_6 = arith.constant 0 : index
    %7 = vector.load %arg3[%c0_5, %c0_6] : memref<256x128xbf16, #tpu.memory_space<vmem>>, vector<128x128xbf16>
    %c128 = arith.constant 128 : index
    %c0_7 = arith.constant 0 : index
    %8 = vector.load %arg3[%c128, %c0_7] : memref<256x128xbf16, #tpu.memory_space<vmem>>, vector<128x128xbf16>
    %9 = arith.truncf %6 : vector<8x128xf32> to vector<8x128xbf16>
    %cst = arith.constant dense<0.000000e+00> : vector<8x128xf32>
    %10 = tpu.matmul %9, %7, %cst {dimension_numbers = #tpu.dot_dimension_numbers<[1], [0], [0], [1], [0, 0, 1, 1], [], []>} : vector<8x128xbf16>, vector<128x128xbf16>, vector<8x128xf32> -> vector<8x128xf32>
    %11 = arith.truncf %10 : vector<8x128xf32> to vector<8x128xbf16>
    %cst_8 = arith.constant dense<0.000000e+00> : vector<8x128xf32>
    %12 = tpu.matmul %11, %8, %cst_8 {dimension_numbers = #tpu.dot_dimension_numbers<[1], [0], [0], [1], [0, 0, 1, 1], [], []>} : vector<8x128xbf16>, vector<128x128xbf16>, vector<8x128xf32> -> vector<8x128xf32>
    %13 = tpu.iota {dimensions = array<i32: 1>} : vector<8x128xi32>
    %c48_i32 = arith.constant 48 : i32
    %14 = vector.broadcast %c48_i32 : i32 to vector<8x128xi32>
    %15 = arith.cmpi sge, %13, %14 : vector<8x128xi32>
    %c64_i32 = arith.constant 64 : i32
    %16 = vector.broadcast %c64_i32 : i32 to vector<8x128xi32>
    %17 = arith.cmpi slt, %13, %16 : vector<8x128xi32>
    %18 = arith.andi %15, %17 : vector<8x128xi1>
    %19 = arith.subf %4, %10 : vector<8x128xf32>
    %cst_9 = arith.constant 0.000000e+00 : f32
    %20 = vector.broadcast %cst_9 : f32 to vector<8x128xf32>
    %21 = arith.select %18, %19, %20 : vector<8x128xi1>, vector<8x128xf32>
    %22 = arith.subf %4, %12 : vector<8x128xf32>
    %cst_10 = arith.constant 0.000000e+00 : f32
    %23 = vector.broadcast %cst_10 : f32 to vector<8x128xf32>
    %24 = arith.select %18, %22, %23 : vector<8x128xi1>, vector<8x128xf32>
    %25 = arith.mulf %21, %21 : vector<8x128xf32>
    %cst_11 = arith.constant dense<0.000000e+00> : vector<8xf32>
    %26 = vector.multi_reduction <add>, %25, %cst_11 [1] : vector<8x128xf32> to vector<8xf32>
    %27 = vector.shape_cast %26 : vector<8xf32> to vector<8x1xf32>
    %28 = arith.mulf %24, %24 : vector<8x128xf32>
    %cst_12 = arith.constant dense<0.000000e+00> : vector<8xf32>
    %29 = vector.multi_reduction <add>, %28, %cst_12 [1] : vector<8x128xf32> to vector<8xf32>
    %30 = vector.shape_cast %29 : vector<8xf32> to vector<8x1xf32>
    %31 = vector.extract_strided_slice %10 {offsets = [0, 64], sizes = [8, 1], strides = [1, 1]} : vector<8x128xf32> to vector<8x1xf32>
    %cst_13 = arith.constant 2.07944155 : f32
    %32 = vector.broadcast %cst_13 : f32 to vector<8x1xf32>
    %33 = arith.minimumf %31, %32 : vector<8x1xf32>
    %34 = vector.extract_strided_slice %12 {offsets = [0, 64], sizes = [8, 1], strides = [1, 1]} : vector<8x128xf32> to vector<8x1xf32>
    %cst_14 = arith.constant 2.07944155 : f32
    %35 = vector.broadcast %cst_14 : f32 to vector<8x1xf32>
    %36 = arith.minimumf %34, %35 : vector<8x1xf32>
    %cst_15 = arith.constant -2.000000e+00 : f32
    %37 = vector.broadcast %cst_15 : f32 to vector<8x1xf32>
    %38 = arith.mulf %37, %36 : vector<8x1xf32>
    %39 = math.exp %38 : vector<8x1xf32>
    %40 = arith.mulf %30, %39 : vector<8x1xf32>
    %cst_16 = arith.constant -2.000000e+00 : f32
    %41 = vector.broadcast %cst_16 : f32 to vector<8x1xf32>
    %42 = arith.mulf %41, %33 : vector<8x1xf32>
    %43 = math.exp %42 : vector<8x1xf32>
    %44 = arith.mulf %27, %43 : vector<8x1xf32>
    %45 = arith.addf %40, %44 : vector<8x1xf32>
    %cst_17 = arith.constant -5.000000e-01 : f32
    %46 = vector.broadcast %cst_17 : f32 to vector<8x1xf32>
    %47 = arith.mulf %46, %45 : vector<8x1xf32>
    %48 = arith.addf %36, %33 : vector<8x1xf32>
    %cst_18 = arith.constant 1.600000e+01 : f32
    %49 = vector.broadcast %cst_18 : f32 to vector<8x1xf32>
    %50 = arith.mulf %49, %48 : vector<8x1xf32>
    %51 = arith.subf %47, %50 : vector<8x1xf32>
    %cst_19 = arith.constant 29.4060326 : f32
    %52 = vector.broadcast %cst_19 : f32 to vector<8x1xf32>
    %53 = arith.subf %51, %52 : vector<8x1xf32>
    %54 = vector.shape_cast %53 : vector<8x1xf32> to vector<1x8x1xf32>
    %cst_20 = arith.constant dense<0.000000e+00> : vector<1xf32>
    %55 = vector.multi_reduction <add>, %54, %cst_20 [1, 2] : vector<1x8x1xf32> to vector<1xf32>
    %56 = vector.shape_cast %55 : vector<1xf32> to vector<1x1x1xf32>
    %57 = vector.extract %56[0, 0, 0] : f32 from vector<1x1x1xf32>
    %cst_21 = arith.constant 8.000000e+00 : f32
    %58 = arith.divf %57, %cst_21 : f32
    %cst_22 = arith.constant 0.000000e+00 : f32
    %59 = arith.subf %cst_22, %58 : f32
    %c32_i32 = arith.constant 32 : i32
    %60 = vector.broadcast %c32_i32 : i32 to vector<8x128xi32>
    %61 = arith.cmpi slt, %13, %60 : vector<8x128xi32>
    %62 = vector.broadcast %59 : f32 to vector<8x128xf32>
    %63 = arith.select %61, %10, %62 : vector<8x128xi1>, vector<8x128xf32>
    %c0_23 = arith.constant 0 : index
    %c0_24 = arith.constant 0 : index
    %c0_25 = arith.constant 0 : index
    %64 = vector.load %arg4[%c0_23, %c0_24, %c0_25] : memref<1x8x128xf32, #tpu.memory_space<vmem>>, vector<1x8x128xf32>
    %65 = vector.shape_cast %64 : vector<1x8x128xf32> to vector<8x128xf32>
    %66 = vector.shape_cast %63 : vector<8x128xf32> to vector<1x8x128xf32>
    tpu.vector_store %arg4[%c0_23, %c0_24, %c0_25], %66 {strides = array<i32>} : memref<1x8x128xf32, #tpu.memory_space<vmem>>, vector<1x8x128xf32>,
    %c32_i32_26 = arith.constant 32 : i32
    %67 = vector.broadcast %c32_i32_26 : i32 to vector<8x128xi32>
    %68 = arith.cmpi slt, %13, %67 : vector<8x128xi32>
    %cst_27 = arith.constant 0.000000e+00 : f32
    %69 = vector.broadcast %cst_27 : f32 to vector<8x128xf32>
    %70 = arith.select %68, %10, %69 : vector<8x128xi1>, vector<8x128xf32>
    %c0_28 = arith.constant 0 : index
    %c0_29 = arith.constant 0 : index
    %71 = vector.load %arg5[%c0_28, %c0_29] : memref<8x128xf32, #tpu.memory_space<vmem>>, vector<8x128xf32>
    tpu.vector_store %arg5[%c0_28, %c0_29], %70 {strides = array<i32>} : memref<8x128xf32, #tpu.memory_space<vmem>>, vector<8x128xf32>,
    return
  }
  func.func @transform_0(%arg0: i32) -> (i32, i32) {
    %c0_i32 = arith.constant 0 : i32
    %c0_i32_0 = arith.constant 0 : i32
    %c0_i32_1 = arith.constant 0 : i32
    return %c0_i32, %c0_i32_0 : i32, i32
  }
  func.func @transform_1(%arg0: i32) -> (i32, i32, i32) {
    %c0_i32 = arith.constant 0 : i32
    %c0_i32_0 = arith.constant 0 : i32
    %c0_i32_1 = arith.constant 0 : i32
    return %arg0, %c0_i32, %c0_i32_0 : i32, i32, i32
  }
  func.func @transform_2(%arg0: i32) -> (i32, i32) {
    %c0_i32 = arith.constant 0 : i32
    %c0_i32_0 = arith.constant 0 : i32
    %c0_i32_1 = arith.constant 0 : i32
    return %c0_i32, %c0_i32_0 : i32, i32
  }
  func.func @transform_3(%arg0: i32) -> (i32, i32, i32) {
    %c0_i32 = arith.constant 0 : i32
    %c0_i32_0 = arith.constant 0 : i32
    %c0_i32_1 = arith.constant 0 : i32
    return %arg0, %c0_i32, %c0_i32_0 : i32, i32, i32
  }
}

</mosaic_0001>

<bundles_post_ra>
// kernel: dan_rollout.1
= control target key start
LH: loop header
LB: loop body
LE: loop exit
PB: predicated region body
PF: predicated region fallthrough
CT: control target
= control target key end

     0   :  { %8 = vsyncpa [#allocation4], 0  ;;  %s435_s12 = smov [#allocation3]   ;;  %s492_s0 = inlined_call_operand.vmem [shape: f32[8,128], index: 0, kind: input, shape index: {}]   ;;  %s493_s1 = inlined_call_operand.vmem [shape: f32[1,8,128], index: 1, kind: input, shape index: {}]   ;;  %s494_s2 = inlined_call_operand.hbm [shape: bf16[256,128], index: 2, kind: input, shape index: {}]   ;;  %s495_s3 = inlined_call_operand.vmem [shape: f32[1,8,128], index: 3, kind: output, shape index: {}]  }
   0x1   :  { %s18_s13 = sshll.u32 %s435_s12, 4  ;;  %s411_s16 = scalar_lea.hbm %s494_s2, 2048  ;;  %s19_s13 = int_to_ptr.vmem [resolvable:$true] %s18_s13 }
   0x2   :  { %p412_p0 = scmp.ne.s32.totalorder %s494_s2, %s411_s16  ;;  %p415_p1 = scmp.lt.u32.totalorder %s411_s16, %s494_s2 }
   0x4   :  { %p417_p2 = pnand %p415_p1, %p412_p0 }
   0x6   :  { %420 = shalt.err (!%p417_p2)
}
   0x7   :  { %s421_s21 = scalar_lea.vmem %s19_s13, 2048  ;;  %p426_p4 = scmp.lt.s32.totalorder %s19_s13, %s19_s13 }
   0x8   :  { %p422_p3 = scmp.ne.s32.totalorder %s19_s13, %s421_s21  ;;  %p427_p5 = scmp.lt.s32.totalorder %s421_s21, %s421_s21 }
   0xa   :  { %p428_p6 = por %p427_p5, %p426_p4 }
   0xc   :  { %p429_p7 = pnand %p428_p6, %p422_p3 }
   0xe   :  { %432 = shalt.err (!%p429_p7)
}
   0xf   :  { %s436_s22 = smov 64   ;;  %s437_s23 = smov 4  }
  0x10   :  { %24 = dma.hbm_to_vmem [thread:$0]  %s494_s2, 2048, %s19_s13, [#allocation4], %s436_s22, %s436_s22, %s437_s23  }
  0x11   :  { %433 = dma.done.wait [#allocation4], 2048  }
  0x12   :  { %434 = vsyncadd [#allocation4], 4294965248  ;;  %v438_v0 = vmov 0.0   ;;  %vm439_vm0 = vmmov 0   ;;  %v391_v1 = vld [vmem:[#allocation3] sm:$0xff]   ;;  %v392_v2 = vld [vmem:[#allocation3 + $0x8] sm:$0xff]   ;;  %v248_v21 = vlaneseq }
  0x13   :  { %344 = vmatprep.subr.bf16.mxu0 %v438_v0  ;;  %360 = vmatprep.mubr.msk.bf16.mxu0 %vm439_vm0, %v438_v0  ;;  %v393_v3 = vld [vmem:[#allocation3 + $0x10] sm:$0xff]   ;;  %v399_v4 = vld [vmem:[#allocation3 + $0x40] sm:$0xff]   ;;  %v394_v5 = vld [vmem:[#allocation3 + $0x18] sm:$0xff]   ;;  %vm283_vm4 = vcmask 7168  }
  0x14   :  { %364 = vmatprep.subr.bf16.mxu1 %v438_v0  ;;  %380 = vmatprep.mubr.msk.bf16.mxu1 %vm439_vm0, %v438_v0  ;;  %v400_v6 = vld [vmem:[#allocation3 + $0x48] sm:$0xff]   ;;  %v395_v7 = vld [vmem:[#allocation3 + $0x20] sm:$0xff]   ;;  %v401_v8 = vld [vmem:[#allocation3 + $0x50] sm:$0xff]   ;;  %v249_v22 = vand.u32 127, %v248_v21 }
  0x15   :  { %345 = vmatpush3.bf16.msra.mxu0 %v391_v1  ;;  %365 = vmatpush3.bf16.msra.mxu1 %v399_v4  ;;  %v396_v9 = vld [vmem:[#allocation3 + $0x28] sm:$0xff]   ;;  %v402_v10 = vld [vmem:[#allocation3 + $0x58] sm:$0xff]   ;;  %v397_v11 = vld [vmem:[#allocation3 + $0x30] sm:$0xff]  }
  0x16   :  { %346 = vmatprep.subr.bf16.mxu0 %v438_v0  ;;  %366 = vmatprep.subr.bf16.mxu1 %v438_v0  ;;  %v33_v12 = vld [vmem:[%s492_s0] sm:$0xff]  ;;  %v398_v16 = vld [vmem:[#allocation3 + $0x38] sm:$0xff]   ;;  %v404_v17 = vld [vmem:[#allocation3 + $0x68] sm:$0xff]   ;;  %vm250_vm1 = vcmp.ge.s32.totalorder %v249_v22, 48  ;;  %vm251_vm2 = vcmp.lt.s32.totalorder %v249_v22, 64  ;;  %vm298_vm5 = vcmp.lt.s32.totalorder %v249_v22, 32 }
  0x17   :  { %v35_v13 = vld [vmem:[%s493_s1] sm:$0xff]  ;;  %v405_v19 = vld [vmem:[#allocation3 + $0x70] sm:$0xff]   ;;  %v406_v20 = vld [vmem:[#allocation3 + $0x78] sm:$0xff]  }
  0x18   :  { %v403_v14 = vld [vmem:[#allocation3 + $0x60] sm:$0xff]   ;;  %v37_v15 = vadd.f32 %v35_v13, %v33_v12  ;;  %vm480_vm3 = vmand %vm250_vm1, %vm251_vm2 }
  0x19   :  { %347 = vmatpush3.bf16.msra.mxu0 %v392_v2  ;;  %367 = vmatpush3.bf16.msra.mxu1 %v400_v6 }
  0x1a   :  { %348 = vmatprep.subr.bf16.mxu0 %v438_v0  ;;  %368 = vmatprep.subr.bf16.mxu1 %v438_v0  ;;  %v70_v18 = vpack.c.bf16 %v37_v15, %v37_v15 }
  0x1d   :  { %349 = vmatpush3.bf16.msra.mxu0 %v393_v3  ;;  %369 = vmatpush3.bf16.msra.mxu1 %v401_v8 }
  0x1e   :  { %350 = vmatprep.subr.bf16.mxu0 %v438_v0  ;;  %370 = vmatprep.subr.bf16.mxu1 %v438_v0 }
  0x21   :  { %351 = vmatpush3.bf16.msra.mxu0 %v394_v5  ;;  %371 = vmatpush3.bf16.msra.mxu1 %v402_v10 }
  0x22   :  { %352 = vmatprep.subr.bf16.mxu0 %v438_v0  ;;  %372 = vmatprep.subr.bf16.mxu1 %v438_v0 }
  0x25   :  { %353 = vmatpush3.bf16.msra.mxu0 %v395_v7  ;;  %373 = vmatpush3.bf16.msra.mxu1 %v403_v14 }
  0x26   :  { %354 = vmatprep.subr.bf16.mxu0 %v438_v0  ;;  %374 = vmatprep.subr.bf16.mxu1 %v438_v0 }
  0x29   :  { %355 = vmatpush3.bf16.msra.mxu0 %v396_v9  ;;  %375 = vmatpush3.bf16.msra.mxu1 %v404_v17 }
  0x2a   :  { %356 = vmatprep.subr.bf16.mxu0 %v438_v0  ;;  %376 = vmatprep.subr.bf16.mxu1 %v438_v0 }
  0x2d   :  { %357 = vmatpush3.bf16.msra.mxu0 %v397_v11  ;;  %377 = vmatpush3.bf16.msra.mxu1 %v405_v19 }
  0x2e   :  { %358 = vmatprep.subr.bf16.mxu0 %v438_v0  ;;  %378 = vmatprep.subr.bf16.mxu1 %v438_v0 }
  0x31   :  { %359 = vmatpush3.bf16.msra.mxu0 %v398_v16  ;;  %379 = vmatpush3.bf16.msra.mxu1 %v406_v20 }
  0x34   :  { %361 = vmatmul.mubr.bf16.vlgmr.msra.gmra.mrb[0].mxu0 %v70_v18 }
 0x107   :  { %v153_v23 = vpop.f32.mrb[0].mxu0 }
 0x108   :  { %v362_v25 = vpop.f32.mrb[1].mxu0  ;;  %v159_v26 = vpack.c.bf16 %v153_v23, %v153_v23  ;;  %v253_v27 = vsub.f32 %v35_v13, %v153_v23  ;;  %v263_v33 = vmin.f32 %v153_v23, 2.0794415 }
 0x109   :  { %v156_v28 = vpop.f32.mrb[2].mxu0 }
 0x10a   :  { %v363_v29 = vpop.f32.mrb[3].mxu0  ;;  %381 = vmatmul.mubr.bf16.vlgmr.msra.gmra.mrb[0].mxu1 %v159_v26  ;;  %v254_v30 = vsel %vm480_vm3, %v253_v27, 0.0  ;;  %v269_v42 = vmul.f32 -2.0, %v263_v33 }
 0x10b   :  { %v257_v31 = vmul.f32 %v254_v30, %v254_v30 }
 0x10c   :  { %v270_v44 = vmul.f32 1.442695, %v269_v42 }
 0x10d   :  { %258 = vadd.xlane.f32.xlu0 %v257_v31 }
 0x10e   :  { %407 = vpow2.f32 %v270_v44 }
 0x118   :  { %v408_v47 = vpop.eup %407 }
 0x19a   :  { %v259_v46 = vpop.xlane.xlu0 %258 }
 0x19b   :  { %v272_v50 = vmul.f32 %v408_v47, %v259_v46 }
 0x1dd   :  { %v242_v32 = vpop.f32.mrb[0].mxu1 }
 0x1de   :  { %v255_v34 = vsub.f32 %v35_v13, %v242_v32  ;;  %v264_v35 = vmin.f32 %v242_v32, 2.0794415  ;;  %v382_v36 = vpop.f32.mrb[1].mxu1 }
 0x1df   :  { %v245_v37 = vpop.f32.mrb[2].mxu1 }
 0x1e0   :  { %v383_v38 = vpop.f32.mrb[3].mxu1  ;;  %v256_v39 = vsel %vm480_vm3, %v255_v34, 0.0  ;;  %v275_v40 = vadd.f32 %v264_v35, %v263_v33  ;;  %v265_v43 = vmul.f32 -2.0, %v264_v35 }
 0x1e1   :  { %v260_v41 = vmul.f32 %v256_v39, %v256_v39 }
 0x1e2   :  { %v266_v45 = vmul.f32 1.442695, %v265_v43  ;;  %v276_v54 = vmul.f32 16.0, %v275_v40 }
 0x1e3   :  { %261 = vadd.xlane.f32.xlu0 %v260_v41 }
 0x1e4   :  { %409 = vpow2.f32 %v266_v45 }
 0x1ee   :  { %v410_v48 = vpop.eup %409 }
 0x270   :  { %v262_v49 = vpop.xlane.xlu0 %261 }
 0x271   :  { %v268_v51 = vmul.f32 %v410_v48, %v262_v49 }
 0x273   :  { %v273_v52 = vadd.f32 %v272_v50, %v268_v51 }
 0x275   :  { %v274_v53 = vmul.f32 -0.5, %v273_v52 }
 0x277   :  { %v277_v55 = vsub.f32 %v274_v53, %v276_v54 }
 0x279   :  { %v325_v56 = vadd.f32 -29.406033, %v277_v55 }
 0x27b   :  { %280 = vrot.lane.b32.xlu1 %v325_v56, %s436_s22 }
 0x2ed   :  { %v281_v57 = vpop.permute.xlu1 %280 }
 0x2ee   :  { %v284_v58 = vsel %vm283_vm4, %v281_v57, 0.0 }
 0x2ef   :  { %285 = vadd.xlane.f32.xlu1 %v284_v58 }
 0x37c   :  { %v286_v59 = vpop.xlane.xlu1 %285 }
 0x37d   :  { %v287_v60 = vrot.slane %v286_v59, 4 }
 0x37f   :  { %v288_v61 = vadd.f32 %v287_v60, %v286_v59 }
 0x381   :  { %v289_v62 = vrot.slane %v288_v61, 2 }
 0x383   :  { %v290_v63 = vadd.f32 %v289_v62, %v288_v61 }
 0x385   :  { %v291_v0 = vrot.slane %v290_v63, 1 }
 0x387   :  { %v292_v1 = vadd.f32 %v291_v0, %v290_v63 }
 0x389   :  { %384 = vpush %v292_v1 }
 0x3ba   :  { %s385_s0 = spop %384 }
 0x3bb   :  { %s296_s1 = smul.f32 0.125, %s385_s0 }
 0x3bd   :  { %s297_s29 = ssub.f32 0.0, %s296_s1 }
 0x3bf   :  { %v299_v2 = vstv %s297_s29 }
 0x3c0   :  { %v300_v3 = vsel %vm298_vm5, %v153_v23, %v299_v2 }
 0x3c1   :  { %301 = vst [vmem:[%s495_s3] sm:$0xff] %v300_v3 }
 0x3c2   :  { %308 = vsyncpa [#allocation4], 1 }

</bundles_post_ra>
